<compile_context>
chip_gen: v7x
topology: tpu7x:2x2x1
jax: 0.10.0
libtpu: 0.0.40
codegen_flags: <defaults>
</compile_context>

<pallas_src>
import math

import jax
import jax.numpy as jnp
from jax.experimental import pallas as pl
from jax.experimental.pallas import tpu as pltpu

_LANES = 128
_SUBLANES = 8
_TARGET_BLOCK_BYTES = 2 * 1024 * 1024       # ~2 MiB per input per grid step
_PER_SAMPLE_BLOCK_LIMIT = 4 * 1024 * 1024   # cap for the per-sample weight path
_VMEM_LIMIT = 32 * 1024 * 1024              # safe on v5e/v6e/v7x


def _round_up(a, b):
    return ((a + b - 1) // b) * b


def _sublane_mult(dtype):
    # f32 -> 8, bf16/f16 -> 16, int8/fp8 -> 32 (packed sublane rules).
    return max(_SUBLANES, 32 // jnp.dtype(dtype).itemsize)


def _num_cores():
    """Explicit core-split axis only pays off on multi-TensorCore chips (v7x)."""
    try:
        kind = jax.devices()[0].device_kind.lower()
    except Exception:
        return 1
    return 2 if ("tpu" in kind and "7" in kind) else 1


def _row_tile(dtype):
    """Rows per block so each input block is ~2 MiB regardless of dtype."""
    itemsize = jnp.dtype(dtype).itemsize
    tile = _TARGET_BLOCK_BYTES // (_LANES * itemsize)
    return _round_up(tile, _sublane_mult(dtype))


def _plan_rows(rows, dtype):
    """Pick (tile, nblocks) for a (rows, 128) slab with no wrapper padding."""
    sub = _sublane_mult(dtype)
    max_tile = _row_tile(dtype)
    if rows > max_tile:
        tile = max_tile                       # big input: ~2 MiB blocks
    elif rows >= sub:
        tile = (rows // sub) * sub            # largest sublane multiple <= rows
    else:
        tile = rows                           # tiny input: single full-dim block
    return tile, pl.cdiv(rows, tile)


def _to_slab(x):
    """Lane-dense (rows, 128) view of x. Zero-copy when x.size % 128 == 0."""
    flat = x.reshape(-1)
    n = flat.shape[0]
    rows = pl.cdiv(n, _LANES)
    pad = rows * _LANES - n
    if pad:
        # TODO(synk): sizes not divisible by 128 still pay one pad copy here;
        # the ragged *row* tail (the common case) is masked inside the kernel.
        flat = jnp.pad(flat, (0, pad))
    return flat.reshape(rows, _LANES), rows


# ----------------------------- kernels ------------------------------------ #

def _fold_into_acc(d, acc_ref, tile):
    """Accumulate a (tile, 128) f32 block into the (8, 128) accumulator."""
    if tile % _SUBLANES == 0:
        acc_ref[...] += jnp.sum(d.reshape(-1, _SUBLANES, _LANES), axis=0)
    else:
        # Tiny single-block case (tile < 8): accumulate into sublane 0 only.
        acc_ref[0:1, :] = acc_ref[0:1, :] + jnp.sum(d, axis=0, keepdims=True)


def _make_abs_sum_kernel(tile, steps, valid_rows):
    """sum(|p - t|) with in-kernel masking of the ragged row tail."""
    def kernel(p_ref, t_ref, o_ref, acc_ref):
        c = pl.program_id(0)
        k = pl.program_id(1)

        @pl.when(k == 0)
        def _():
            acc_ref[...] = jnp.zeros_like(acc_ref)

        base = (c * steps + k) * tile

        def accum(mask_tail):
            d = jnp.abs(p_ref[...].astype(jnp.float32)
                        - t_ref[...].astype(jnp.float32))
            if mask_tail:
                row = base + jax.lax.broadcasted_iota(
                    jnp.int32, (tile, _LANES), 0)
                d = jnp.where(row < valid_rows, d, 0.0)
            _fold_into_acc(d, acc_ref, tile)

        full = base + tile <= valid_rows

        @pl.when(full)
        def _():
            accum(False)

        @pl.when(jnp.logical_not(full))
        def _():
            accum(True)

        @pl.when(k == steps - 1)
        def _():
            o_ref[...] = acc_ref[...].reshape(1, _SUBLANES, _LANES)

    return kernel


def _make_wabs_sum_kernel(tile, steps, valid_rows):
    """sum(w * |p - t|) and sum(w) fused (full-shape weight slab)."""
    def kernel(p_ref, t_ref, w_ref, o_ref, ws_ref, acc_ref, wacc_ref):
        c = pl.program_id(0)
        k = pl.program_id(1)

        @pl.when(k == 0)
        def _():
            acc_ref[...] = jnp.zeros_like(acc_ref)
            wacc_ref[...] = jnp.zeros_like(wacc_ref)

        base = (c * steps + k) * tile

        def accum(mask_tail):
            p = p_ref[...].astype(jnp.float32)
            t = t_ref[...].astype(jnp.float32)
            w = w_ref[...].astype(jnp.float32)
            d = jnp.abs(p - t) * w
            if mask_tail:
                row = base + jax.lax.broadcasted_iota(
                    jnp.int32, (tile, _LANES), 0)
                keep = row < valid_rows
                d = jnp.where(keep, d, 0.0)
                w = jnp.where(keep, w, 0.0)
            _fold_into_acc(d, acc_ref, tile)
            _fold_into_acc(w, wacc_ref, tile)

        full = base + tile <= valid_rows

        @pl.when(full)
        def _():
            accum(False)

        @pl.when(jnp.logical_not(full))
        def _():
            accum(True)

        @pl.when(k == steps - 1)
        def _():
            o_ref[...] = acc_ref[...].reshape(1, _SUBLANES, _LANES)
            ws_ref[...] = wacc_ref[...].reshape(1, _SUBLANES, _LANES)

    return kernel


def _abs_elem_kernel(p_ref, t_ref, o_ref):
    """Elementwise |p - t| (reduction='none')."""
    o_ref[...] = jnp.abs(p_ref[...].astype(jnp.float32)
                         - t_ref[...].astype(jnp.float32)).astype(o_ref.dtype)


def _wabs_elem_kernel(p_ref, t_ref, w_ref, o_ref):
    """Elementwise w * |p - t|; the weight block broadcasts over channels."""
    d = jnp.abs(p_ref[...].astype(jnp.float32)
                - t_ref[...].astype(jnp.float32))
    o_ref[...] = (d * w_ref[...].astype(jnp.float32)).astype(o_ref.dtype)


def _wabs_sum_per_sample_kernel(p_ref, t_ref, w_ref, o_ref, ws_ref):
    """Per-sample sum(w*|p-t|) and sum(w); weight broadcasts over channels."""
    p = p_ref[...].astype(jnp.float32)   # (1, C, HW)
    t = t_ref[...].astype(jnp.float32)
    w = w_ref[...].astype(jnp.float32)   # (1, 1, HW)
    d = (jnp.abs(p - t) * w)[0]          # (C, HW)
    o_ref[...] = jnp.sum(d).reshape(1, 1, 1)
    ws_ref[...] = jnp.sum(w[0]).reshape(1, 1, 1)


# ----------------------------- wrappers ------------------------------------ #

def _sum_flat(pred, target, weight=None):
    """(sum(w*|p-t|), sum(w) or None) over lane-dense flat slabs."""
    p2, rows = _to_slab(pred)
    t2, _ = _to_slab(target)
    tile, nblocks = _plan_rows(rows, pred.dtype)
    ncores = _num_cores() if nblocks > 1 else 1
    steps = pl.cdiv(nblocks, ncores)
    last_block = nblocks - 1

    # Clamp phantom block indices (when nblocks % ncores != 0); the kernel's
    # row mask zeroes their contribution.
    def in_idx(c, k):
        return (jnp.minimum(c * steps + k, last_block), 0)

    in_spec = pl.BlockSpec((tile, _LANES), in_idx)
    part_spec = pl.BlockSpec((1, _SUBLANES, _LANES), lambda c, k: (c, 0, 0))
    part_shape = jax.ShapeDtypeStruct((ncores, _SUBLANES, _LANES), jnp.float32)
    cparams = pltpu.CompilerParams(
        dimension_semantics=("parallel", "arbitrary"),
        vmem_limit_bytes=_VMEM_LIMIT)

    if weight is None:
        parts = pl.pallas_call(
            _make_abs_sum_kernel(tile, steps, rows),
            out_shape=part_shape,
            grid_spec=pltpu.PrefetchScalarGridSpec(
                num_scalar_prefetch=0,
                grid=(ncores, steps),
                in_specs=[in_spec, in_spec],
                out_specs=part_spec,
                scratch_shapes=[pltpu.VMEM((_SUBLANES, _LANES), jnp.float32)]),
            compiler_params=cparams,
        )(p2, t2)
        return jnp.sum(parts), None

    w2, _ = _to_slab(weight)
    parts, wparts = pl.pallas_call(
        _make_wabs_sum_kernel(tile, steps, rows),
        out_shape=(part_shape, part_shape),
        grid_spec=pltpu.PrefetchScalarGridSpec(
            num_scalar_prefetch=0,
            grid=(ncores, steps),
            in_specs=[in_spec, in_spec, in_spec],
            out_specs=(part_spec, part_spec),
            scratch_shapes=[pltpu.VMEM((_SUBLANES, _LANES), jnp.float32),
                            pltpu.VMEM((_SUBLANES, _LANES), jnp.float32)]),
        compiler_params=cparams,
    )(p2, t2, w2)
    return jnp.sum(parts), jnp.sum(wparts)


def _sum_per_sample(pred, target, weight):
    """Weighted sum for a channel-singleton weight, no broadcast materialized."""
    N, C = pred.shape[0], pred.shape[1]
    hw = int(pred.size // (N * C))
    p3 = pred.reshape(N, C, hw)
    t3 = target.reshape(N, C, hw)
    w3 = weight.reshape(N, 1, hw)

    io_spec = pl.BlockSpec((1, C, hw), lambda n: (n, 0, 0))
    w_spec = pl.BlockSpec((1, 1, hw), lambda n: (n, 0, 0))
    out_spec = pl.BlockSpec((1, 1, 1), lambda n: (n, 0, 0))
    out_shape = jax.ShapeDtypeStruct((N, 1, 1), jnp.float32)

    s_parts, w_parts = pl.pallas_call(
        _wabs_sum_per_sample_kernel,
        out_shape=(out_shape, out_shape),
        grid_spec=pltpu.PrefetchScalarGridSpec(
            num_scalar_prefetch=0,
            grid=(N,),
            in_specs=[io_spec, io_spec, w_spec],
            out_specs=(out_spec, out_spec)),
        compiler_params=pltpu.CompilerParams(
            dimension_semantics=("parallel",),
            vmem_limit_bytes=_VMEM_LIMIT),
    )(p3, t3, w3)
    # basicsr: denominator for a channel-singleton weight is weight.sum() * C.
    return jnp.sum(s_parts), jnp.sum(w_parts) * C


def _elem_flat(pred, target, weight=None):
    """reduction='none' over flat slabs (weight already full shape, if any)."""
    orig_shape = pred.shape
    n = pred.size
    p2, rows = _to_slab(pred)
    t2, _ = _to_slab(target)
    tile, nblocks = _plan_rows(rows, pred.dtype)
    spec = pl.BlockSpec((tile, _LANES), lambda i: (i, 0))

    if weight is None:
        kernel, in_specs, args = _abs_elem_kernel, [spec, spec], (p2, t2)
    else:
        w2, _ = _to_slab(weight)
        kernel, in_specs, args = _wabs_elem_kernel, [spec, spec, spec], (p2, t2, w2)

    out = pl.pallas_call(
        kernel,
        out_shape=jax.ShapeDtypeStruct((rows, _LANES), pred.dtype),
        grid_spec=pltpu.PrefetchScalarGridSpec(
            num_scalar_prefetch=0,
            grid=(nblocks,),
            in_specs=in_specs,
            out_specs=spec),
        compiler_params=pltpu.CompilerParams(
            dimension_semantics=("parallel",),
            vmem_limit_bytes=_VMEM_LIMIT),
    )(*args)
    if rows * _LANES == n:
        return out.reshape(orig_shape)            # zero-copy view back
    return out.reshape(-1)[:n].reshape(orig_shape)


def _elem_per_sample(pred, target, weight):
    """reduction='none' with a channel-singleton weight (no broadcast copy)."""
    N, C = pred.shape[0], pred.shape[1]
    hw = int(pred.size // (N * C))
    p3 = pred.reshape(N, C, hw)
    t3 = target.reshape(N, C, hw)
    w3 = weight.reshape(N, 1, hw)

    io_spec = pl.BlockSpec((1, C, hw), lambda n: (n, 0, 0))
    w_spec = pl.BlockSpec((1, 1, hw), lambda n: (n, 0, 0))
    out = pl.pallas_call(
        _wabs_elem_kernel,
        out_shape=jax.ShapeDtypeStruct((N, C, hw), pred.dtype),
        grid_spec=pltpu.PrefetchScalarGridSpec(
            num_scalar_prefetch=0,
            grid=(N,),
            in_specs=[io_spec, io_spec, w_spec],
            out_specs=io_spec),
        compiler_params=pltpu.CompilerParams(
            dimension_semantics=("parallel",),
            vmem_limit_bytes=_VMEM_LIMIT),
    )(p3, t3, w3)
    return out.reshape(pred.shape)


def _is_channel_singleton_weight(pred, weight):
    if weight.ndim != pred.ndim or pred.ndim < 3:
        return False
    if weight.shape[0] != pred.shape[0] or weight.shape[1] != 1:
        return False
    if weight.shape[2:] != pred.shape[2:] or pred.shape[1] == 1:
        return False
    blk_bytes = math.prod(pred.shape[1:]) * jnp.dtype(pred.dtype).itemsize
    return blk_bytes <= _PER_SAMPLE_BLOCK_LIMIT


def l1_loss_pallas(pred, target, weight=None, loss_weight=1.0, reduction='mean'):
    """Forward of basicsr L1Loss: loss_weight * weighted L1 with reduction."""
    if reduction not in ('none', 'mean', 'sum'):
        raise ValueError(f'Unsupported reduction mode: {reduction}.')

    per_sample_weight = (weight is not None
                         and weight.shape != pred.shape
                         and _is_channel_singleton_weight(pred, weight))
    if (weight is not None and weight.shape != pred.shape
            and not per_sample_weight):
        # TODO(synk): generic broadcastable weights fall back to a materialized
        # broadcast (extra HBM pass); the common (N,1,H,W) case avoids it.
        weight = jnp.broadcast_to(weight, pred.shape)

    if reduction == 'none':
        if weight is not None and per_sample_weight:
            out = _elem_per_sample(pred, target, weight)
        else:
            out = _elem_flat(pred, target, weight)
        return loss_weight * out

    if weight is not None and per_sample_weight:
        s, wsum = _sum_per_sample(pred, target, weight)
    else:
        s, wsum = _sum_flat(pred, target, weight)

    if reduction == 'sum':
        return loss_weight * s

    # reduction == 'mean' (basicsr: divide by sum(weight) when weighted).
    denom = jnp.float32(pred.size) if weight is None else wsum
    return loss_weight * (s / denom)


# ------------------------------ demo --------------------------------------- #

if __name__ == "__main__":
    key = jax.random.PRNGKey(0)
    k1, k2, k3 = jax.random.split(key, 3)
    # Module-implied NCHW inputs at small shapes.
    pred = jax.random.normal(k1, (2, 4, 16, 16), dtype=jnp.float32)
    target = jax.random.normal(k2, (2, 4, 16, 16), dtype=jnp.float32)
    weight = jax.random.uniform(k3, (2, 1, 16, 16), dtype=jnp.float32)

    # Default module config: reduction='mean', no weight.
    loss = jax.block_until_ready(l1_loss_pallas(pred, target, reduction='mean'))
    ref = jnp.mean(jnp.abs(pred - target))
    assert jnp.allclose(loss, ref, rtol=1e-5, atol=1e-6), (loss, ref)

    # reduction='sum', no weight.
    sloss = jax.block_until_ready(l1_loss_pallas(pred, target, reduction='sum'))
    sref = jnp.sum(jnp.abs(pred - target))
    assert jnp.allclose(sloss, sref, rtol=1e-5, atol=1e-4), (sloss, sref)

    # Weighted mean with a channel-singleton weight (basicsr semantics).
    wloss = jax.block_until_ready(
        l1_loss_pallas(pred, target, weight=weight, reduction='mean'))
    wb = jnp.broadcast_to(weight, pred.shape)
    wref = jnp.sum(wb * jnp.abs(pred - target)) / jnp.sum(wb)
    assert jnp.allclose(wloss, wref, rtol=1e-5, atol=1e-6), (wloss, wref)

    # reduction='none', unweighted and weighted.
    eloss = jax.block_until_ready(l1_loss_pallas(pred, target, reduction='none'))
    assert eloss.shape == pred.shape
    assert jnp.allclose(eloss, jnp.abs(pred - target), rtol=1e-5, atol=1e-5)

    weloss = jax.block_until_ready(
        l1_loss_pallas(pred, target, weight=weight, reduction='none'))
    assert weloss.shape == pred.shape
    assert jnp.allclose(weloss, wb * jnp.abs(pred - target), rtol=1e-5, atol=1e-5)

    print("KERNEL_OK")
</pallas_src>

<mosaic_0001>
module attributes {stable_mosaic.version = 11 : i64} {
  func.func @kernel(%arg0: i32, %arg1: i32, %arg2: memref<16x128xf32, #tpu.memory_space<vmem>>, %arg3: memref<16x128xf32, #tpu.memory_space<vmem>>, %arg4: memref<1x8x128xf32, #tpu.memory_space<vmem>>, %arg5: memref<8x128xf32, #tpu.memory_space<vmem>>) attributes {dimension_semantics = [#tpu.dimension_semantics<parallel>, #tpu.dimension_semantics<arbitrary>], iteration_bounds = array<i64: 1, 1>, scalar_prefetch = 0 : i64, scratch_operands = 1 : i64, tpu.core_type = #tpu.core_type<tc>, window_params = [{transform_indices = @transform_0, window_bounds = array<i64: 16, 128>}, {transform_indices = @transform_1, window_bounds = array<i64: 16, 128>}, {transform_indices = @transform_2, window_bounds = array<i64: 1, 8, 128>}]} {
    %c0_i32 = arith.constant 0 : i32
    %0 = arith.cmpi eq, %arg1, %c0_i32 : i32
    %1 = arith.extui %0 : i1 to i32
    %c0_i32_0 = arith.constant 0 : i32
    %2 = arith.cmpi ne, %1, %c0_i32_0 : i32
    scf.if %2 {
      %cst = arith.constant 0.000000e+00 : f32
      %16 = vector.broadcast %cst : f32 to vector<8x128xf32>
      %c0 = arith.constant 0 : index
      %c0_7 = arith.constant 0 : index
      %17 = vector.load %arg5[%c0, %c0_7] : memref<8x128xf32, #tpu.memory_space<vmem>>, vector<8x128xf32>
      tpu.vector_store %arg5[%c0, %c0_7], %16 {strides = array<i32>} : memref<8x128xf32, #tpu.memory_space<vmem>>, vector<8x128xf32>,
    } else {
    }
    %c1_i32 = arith.constant 1 : i32
    %3 = arith.muli %arg0, %c1_i32 : i32
    %4 = arith.addi %3, %arg1 : i32
    %c16_i32 = arith.constant 16 : i32
    %5 = arith.muli %4, %c16_i32 : i32
    %c16_i32_1 = arith.constant 16 : i32
    %6 = arith.addi %5, %c16_i32_1 : i32
    %c16_i32_2 = arith.constant 16 : i32
    %7 = arith.cmpi sle, %6, %c16_i32_2 : i32
    %8 = arith.extui %7 : i1 to i32
    %c0_i32_3 = arith.constant 0 : i32
    %9 = arith.cmpi ne, %8, %c0_i32_3 : i32
    scf.if %9 {
      %c0 = arith.constant 0 : index
      %c0_7 = arith.constant 0 : index
      %16 = vector.load %arg2[%c0, %c0_7] : memref<16x128xf32, #tpu.memory_space<vmem>>, vector<16x128xf32>
      %c0_8 = arith.constant 0 : index
      %c0_9 = arith.constant 0 : index
      %17 = vector.load %arg3[%c0_8, %c0_9] : memref<16x128xf32, #tpu.memory_space<vmem>>, vector<16x128xf32>
      %18 = arith.subf %16, %17 : vector<16x128xf32>
      %19 = math.absf %18 : vector<16x128xf32>
      %c0_10 = arith.constant 0 : index
      %c0_11 = arith.constant 0 : index
      %20 = vector.load %arg5[%c0_10, %c0_11] : memref<8x128xf32, #tpu.memory_space<vmem>>, vector<8x128xf32>
      %21 = vector.shape_cast %19 : vector<16x128xf32> to vector<2x8x128xf32>
      %cst = arith.constant dense<0.000000e+00> : vector<8x128xf32>
      %22 = vector.multi_reduction <add>, %21, %cst [0] : vector<2x8x128xf32> to vector<8x128xf32>
      %23 = arith.addf %20, %22 : vector<8x128xf32>
      %c0_12 = arith.constant 0 : index
      %c0_13 = arith.constant 0 : index
      %24 = vector.load %arg5[%c0_12, %c0_13] : memref<8x128xf32, #tpu.memory_space<vmem>>, vector<8x128xf32>
      tpu.vector_store %arg5[%c0_12, %c0_13], %23 {strides = array<i32>} : memref<8x128xf32, #tpu.memory_space<vmem>>, vector<8x128xf32>,
    } else {
    }
    %true = arith.constant true
    %10 = arith.xori %7, %true : i1
    %11 = arith.extui %10 : i1 to i32
    %c0_i32_4 = arith.constant 0 : i32
    %12 = arith.cmpi ne, %11, %c0_i32_4 : i32
    scf.if %12 {
      %c0 = arith.constant 0 : index
      %c0_7 = arith.constant 0 : index
      %16 = vector.load %arg2[%c0, %c0_7] : memref<16x128xf32, #tpu.memory_space<vmem>>, vector<16x128xf32>
      %c0_8 = arith.constant 0 : index
      %c0_9 = arith.constant 0 : index
      %17 = vector.load %arg3[%c0_8, %c0_9] : memref<16x128xf32, #tpu.memory_space<vmem>>, vector<16x128xf32>
      %18 = arith.subf %16, %17 : vector<16x128xf32>
      %19 = math.absf %18 : vector<16x128xf32>
      %20 = tpu.iota {dimensions = array<i32: 0>} : vector<16x128xi32>
      %21 = vector.broadcast %5 : i32 to vector<16x128xi32>
      %22 = arith.addi %21, %20 : vector<16x128xi32>
      %c16_i32_10 = arith.constant 16 : i32
      %23 = vector.broadcast %c16_i32_10 : i32 to vector<16x128xi32>
      %24 = arith.cmpi slt, %22, %23 : vector<16x128xi32>
      %cst = arith.constant 0.000000e+00 : f32
      %25 = vector.broadcast %cst : f32 to vector<16x128xf32>
      %26 = arith.select %24, %19, %25 : vector<16x128xi1>, vector<16x128xf32>
      %c0_11 = arith.constant 0 : index
      %c0_12 = arith.constant 0 : index
      %27 = vector.load %arg5[%c0_11, %c0_12] : memref<8x128xf32, #tpu.memory_space<vmem>>, vector<8x128xf32>
      %28 = vector.shape_cast %26 : vector<16x128xf32> to vector<2x8x128xf32>
      %cst_13 = arith.constant dense<0.000000e+00> : vector<8x128xf32>
      %29 = vector.multi_reduction <add>, %28, %cst_13 [0] : vector<2x8x128xf32> to vector<8x128xf32>
      %30 = arith.addf %27, %29 : vector<8x128xf32>
      %c0_14 = arith.constant 0 : index
      %c0_15 = arith.constant 0 : index
      %31 = vector.load %arg5[%c0_14, %c0_15] : memref<8x128xf32, #tpu.memory_space<vmem>>, vector<8x128xf32>
      tpu.vector_store %arg5[%c0_14, %c0_15], %30 {strides = array<i32>} : memref<8x128xf32, #tpu.memory_space<vmem>>, vector<8x128xf32>,
    } else {
    }
    %c0_i32_5 = arith.constant 0 : i32
    %13 = arith.cmpi eq, %arg1, %c0_i32_5 : i32
    %14 = arith.extui %13 : i1 to i32
    %c0_i32_6 = arith.constant 0 : i32
    %15 = arith.cmpi ne, %14, %c0_i32_6 : i32
    scf.if %15 {
      %c0 = arith.constant 0 : index
      %c0_7 = arith.constant 0 : index
      %16 = vector.load %arg5[%c0, %c0_7] : memref<8x128xf32, #tpu.memory_space<vmem>>, vector<8x128xf32>
      %17 = vector.shape_cast %16 : vector<8x128xf32> to vector<1x8x128xf32>
      %c0_8 = arith.constant 0 : index
      %c0_9 = arith.constant 0 : index
      %c0_10 = arith.constant 0 : index
      %18 = vector.load %arg4[%c0_8, %c0_9, %c0_10] : memref<1x8x128xf32, #tpu.memory_space<vmem>>, vector<1x8x128xf32>
      tpu.vector_store %arg4[%c0_8, %c0_9, %c0_10], %17 {strides = array<i32>} : memref<1x8x128xf32, #tpu.memory_space<vmem>>, vector<1x8x128xf32>,
    } else {
    }
    return
  }
  func.func @transform_0(%arg0: i32, %arg1: i32) -> (i32, i32) {
    %c1_i32 = arith.constant 1 : i32
    %0 = arith.muli %arg0, %c1_i32 : i32
    %1 = arith.addi %0, %arg1 : i32
    %c0_i32 = arith.constant 0 : i32
    %2 = arith.minsi %1, %c0_i32 : i32
    %c0_i32_0 = arith.constant 0 : i32
    %c0_i32_1 = arith.constant 0 : i32
    return %2, %c0_i32_0 : i32, i32
  }
  func.func @transform_1(%arg0: i32, %arg1: i32) -> (i32, i32) {
    %c1_i32 = arith.constant 1 : i32
    %0 = arith.muli %arg0, %c1_i32 : i32
    %1 = arith.addi %0, %arg1 : i32
    %c0_i32 = arith.constant 0 : i32
    %2 = arith.minsi %1, %c0_i32 : i32
    %c0_i32_0 = arith.constant 0 : i32
    %c0_i32_1 = arith.constant 0 : i32
    return %2, %c0_i32_0 : i32, i32
  }
  func.func @transform_2(%arg0: i32, %arg1: i32) -> (i32, i32, i32) {
    %c0_i32 = arith.constant 0 : i32
    %c0_i32_0 = arith.constant 0 : i32
    %c0_i32_1 = arith.constant 0 : i32
    return %arg0, %c0_i32, %c0_i32_0 : i32, i32, i32
  }
}

</mosaic_0001>

<bundles_post_ra>
// kernel: tpu_custom_call.1
= control target key start
LH: loop header
LB: loop body
LE: loop exit
PB: predicated region body
PF: predicated region fallthrough
CT: control target
= control target key end

     0   :  { %7 = vsyncpa [#allocation4], 0  ;;  %s268_s0 = inlined_call_operand.hbm [shape: f32[16,128], index: 0, kind: input, shape index: {}]   ;;  %s269_s1 = inlined_call_operand.hbm [shape: f32[16,128], index: 1, kind: input, shape index: {}]   ;;  %s270_s2 = inlined_call_operand.hbm [shape: f32[1,8,128], index: 2, kind: output, shape index: {}]  }
   0x1   :  { %8 = vsyncpa [#allocation7], 0 }
   0x2   :  { %9 = vsyncpa [#allocation5], 0  ;;  %s212_s9 = smov [#allocation3]   ;;  %s140_s13 = scalar_lea.hbm %s268_s0, 256 }
   0x3   :  { %s21_s10 = sshll.u32 %s212_s9, 4  ;;  %p141_p0 = scmp.ne.s32.totalorder %s268_s0, %s140_s13  ;;  %s22_s10 = int_to_ptr.vmem [resolvable:$true] %s21_s10 }
   0x4   :  { %p144_p1 = scmp.lt.u32.totalorder %s140_s13, %s268_s0 }
   0x6   :  { %p146_p2 = pnand %p144_p1, %p141_p0 }
   0x8   :  { %149 = shalt.err (!%p146_p2)
}
   0x9   :  { %s150_s18 = scalar_lea.vmem %s22_s10, 256  ;;  %p155_p4 = scmp.lt.s32.totalorder %s22_s10, %s22_s10 }
   0xa   :  { %p151_p3 = scmp.ne.s32.totalorder %s22_s10, %s150_s18  ;;  %p156_p5 = scmp.lt.s32.totalorder %s150_s18, %s150_s18 }
   0xc   :  { %p157_p6 = por %p156_p5, %p155_p4 }
   0xe   :  { %p158_p7 = pnand %p157_p6, %p151_p3 }
  0x10   :  { %161 = shalt.err (!%p158_p7)
}
  0x11   :  { %s213_s19 = smov 128   ;;  %s214_s20 = smov 8  }
  0x12   :  { %27 = dma.hbm_to_vmem [thread:$0]  %s268_s0, 256, %s22_s10, [#allocation4], %s213_s19, %s213_s19, %s214_s20  }
  0x13   :  { %s215_s23 = smov [#allocation6]   ;;  %s162_s27 = scalar_lea.hbm %s269_s1, 256 }
  0x14   :  { %s39_s24 = sshll.u32 %s215_s23, 4  ;;  %p163_p8 = scmp.ne.s32.totalorder %s269_s1, %s162_s27  ;;  %s40_s24 = int_to_ptr.vmem [resolvable:$true] %s39_s24 }
  0x15   :  { %p166_p9 = scmp.lt.u32.totalorder %s162_s27, %s269_s1 }
  0x17   :  { %p168_p10 = pnand %p166_p9, %p163_p8 }
  0x19   :  { %171 = shalt.err (!%p168_p10)
}
  0x1a   :  { %s172_s4 = scalar_lea.vmem %s40_s24, 256  ;;  %p177_p12 = scmp.lt.s32.totalorder %s40_s24, %s40_s24 }
  0x1b   :  { %p173_p11 = scmp.ne.s32.totalorder %s40_s24, %s172_s4  ;;  %p178_p13 = scmp.lt.s32.totalorder %s172_s4, %s172_s4 }
  0x1d   :  { %p179_p0 = por %p178_p13, %p177_p12 }
  0x1f   :  { %p180_p1 = pnand %p179_p0, %p173_p11 }
  0x21   :  { %183 = shalt.err (!%p180_p1)
}
  0x22   :  { %45 = dma.hbm_to_vmem [thread:$0]  %s269_s1, 256, %s40_s24, [#allocation7], %s213_s19, %s213_s19, %s214_s20  }
  0x23   :  { %206 = dma.done.wait [#allocation4], 256  }
  0x24   :  { %207 = vsyncadd [#allocation4], 4294967040 }
  0x25   :  { %208 = dma.done.wait [#allocation7], 256  }
  0x26   :  { %209 = vsyncadd [#allocation7], 4294967040  ;;  %v72_v0 = vld [vmem:[#allocation3] sm:$0xff]  ;;  %v73_v1 = vld [vmem:[#allocation3 + $0x8] sm:$0xff]  ;;  %s216_s6 = smov [#allocation8]  }
  0x27   :  { %v74_v2 = vld [vmem:[#allocation6] sm:$0xff]  ;;  %v75_v3 = vld [vmem:[#allocation6 + $0x8] sm:$0xff]  ;;  %s121_s7 = sshll.u32 %s216_s6, 4  ;;  %s122_s7 = int_to_ptr.vmem [resolvable:$true] %s121_s7 }
  0x28   :  { %v76_v4 = vsub.f32 %v72_v0, %v74_v2  ;;  %v77_v5 = vsub.f32 %v73_v1, %v75_v3  ;;  %s184_s8 = scalar_lea.vmem %s122_s7, 128  ;;  %p189_p3 = scmp.lt.s32.totalorder %s122_s7, %s122_s7 }
  0x29   :  { %p185_p2 = scmp.ne.s32.totalorder %s122_s7, %s184_s8  ;;  %p190_p4 = scmp.lt.s32.totalorder %s184_s8, %s184_s8 }
  0x2a   :  { %v78_v6 = vand.u32 2147483647, %v76_v4  ;;  %v79_v7 = vand.u32 2147483647, %v77_v5 }
  0x2b   :  { %p191_p5 = por %p190_p4, %p189_p3 }
  0x2c   :  { %v81_v8 = vadd.f32 %v79_v7, %v78_v6 }
  0x2d   :  { %p192_p6 = pnand %p191_p5, %p185_p2 }
  0x2e   :  { %114 = vst [vmem:[#allocation8] sm:$0xff] %v81_v8 }
  0x2f   :  { %195 = shalt.err (!%p192_p6)
}
  0x30   :  { %s196_s10 = scalar_lea.hbm %s270_s2, 128 }
  0x31   :  { %p197_p7 = scmp.ne.s32.totalorder %s270_s2, %s196_s10  ;;  %p200_p8 = scmp.lt.u32.totalorder %s196_s10, %s270_s2 }
  0x33   :  { %p202_p9 = pnand %p200_p8, %p197_p7 }
  0x35   :  { %205 = shalt.err (!%p202_p9)
}
  0x36   :  { %124 = dma.vmem_to_hbm [thread:$0]  %s122_s7, 128, %s270_s2, [#allocation5]  }
  0x37   :  { %210 = dma.done.wait [#allocation5], 128  }
  0x38   :  { %211 = vsyncadd [#allocation5], 4294967168 }
  0x39   :  { %128 = vsyncpa [#allocation4], 1 }
  0x3a   :  { %129 = vsyncpa [#allocation7], 1 }
  0x3b   :  { %130 = vsyncpa [#allocation5], 1 }

</bundles_post_ra>
